<compile_context>
chip_gen: v5e
topology: v5e:2x2
jax: 0.10.0
libtpu: 0.0.40
codegen_flags: <defaults>
</compile_context>

<pallas_src>
import jax
import jax.numpy as jnp
from jax import lax
from jax.experimental import pallas as pl
from jax.experimental.pallas import tpu as pltpu


def _make_loss_kernel(use_custom_loss: bool, num_classes: int,
                      opposite_class_loss_weight: float, batch: int):
    mid_class = int((num_classes + 1) / 2)
    margin = 1e-20
    w_opp = float(opposite_class_loss_weight)

    def kernel(labels_ref, reps_ref, w_ref, b_ref, out_ref):
        pid = pl.program_id(0)

        # ---- classifier: logits = reps @ W_T  (MXU, f32 accumulate) ----------
        # W arrives pre-transposed as (D, C_pad): plain NN contraction.
        logits = jnp.dot(reps_ref[...], w_ref[...],
                         preferred_element_type=jnp.float32)
        logits = logits + b_ref[...]                               # (TB, C_pad)
        TB, C = logits.shape

        labels = labels_ref[...]                                   # (TB, 1) i32
        cls_ids = lax.broadcasted_iota(jnp.int32, (TB, C), 1)      # (TB, C)
        one_hot = cls_ids == labels                                # (TB, C)

        # Rows past the true batch size (padded last tile) contribute 0.
        row_ids = pid * TB + lax.broadcasted_iota(jnp.int32, (TB, 1), 0)
        row_valid = (row_ids < batch).astype(jnp.float32)          # (TB, 1)

        m = jnp.max(logits, axis=1, keepdims=True)
        e = jnp.exp(logits - m)                                    # pad cls -> 0
        sum_e = jnp.sum(e, axis=1, keepdims=True)

        if use_custom_loss:
            # Exact reciprocal on the (TB,1) denominator: negligible extra EUP
            # work, removes approx-recip error and any 1 - s < 0 NaN risk.
            inv_sum = pl.reciprocal(sum_e, approx=False)
            s_out = e * inv_sum                                    # softmax
            # L = log(1 - s + margin); clamp keeps the log argument > 0.
            inv_log = jnp.log(jnp.maximum(1.0 - s_out, 0.0) + margin)
            # Weighted row sum WITHOUT materializing a (TB, C_pad) weight tile:
            #   sum_c w_bc * L_bc = sum_all(L) - L_true + (w_opp-1)*sum_opp(L)
            # (true class weight 0, opposite-side classes w_opp, same-side 1;
            #  padded classes have s == 0 -> L == 0, so they drop out of every
            #  term regardless of the side they fall on.)
            label_is_low = labels < mid_class                      # (TB, 1)
            cls_is_upper = cls_ids >= mid_class                    # (TB, C)
            is_opposite = jnp.where(label_is_low, cls_is_upper,
                                    jnp.logical_not(cls_is_upper))
            sum_all = jnp.sum(inv_log, axis=1, keepdims=True)
            sum_opp = jnp.sum(jnp.where(is_opposite, inv_log, 0.0),
                              axis=1, keepdims=True)
            l_true = jnp.sum(jnp.where(one_hot, inv_log, 0.0),
                             axis=1, keepdims=True)
            per_row = -(sum_all - l_true + (w_opp - 1.0) * sum_opp)   # (TB, 1)
        else:
            # cross entropy: loss_i = logsumexp(logits_i) - logits_i[label_i]
            lse = m + jnp.log(sum_e)                               # (TB, 1)
            true_logit = jnp.sum(jnp.where(one_hot, logits, 0.0),
                                 axis=1, keepdims=True)            # (TB, 1)
            per_row = lse - true_logit

        partial = jnp.sum(per_row * row_valid)        # loss *sum* for this tile
        # Lane-dense writeback; wrapper reads lane 0 of each tile.
        out_ref[...] = jnp.broadcast_to(partial, out_ref.shape).astype(jnp.float32)

    return kernel


def _pick_batch_tile(B, D, C_pad, stream_itemsize, tile_b):
    """Generation-aware batch tile.

    Budgeted against a conservative 24 MiB so the double-buffered streamed
    operands + resident weights + f32 epilogue temporaries fit the 32 MiB
    scoped-VMEM default (and v7x's 64 MiB physical VMEM) with headroom; capped
    so NT >= 2 whenever B allows, keeping both v7x TensorCores fed.
    """
    budget = 24 << 20
    resident = 2 * C_pad * D * stream_itemsize + 2 * C_pad * 4      # W + bias
    per_row = (2 * D * stream_itemsize          # double-buffered reps row
               + 2 * 128 * 4                    # double-buffered label row (lane pad)
               + 8 * C_pad * 4)                 # f32 epilogue temporaries headroom
    cap = max(8, (budget - resident) // per_row)
    half_b = ((B + 1) // 2 + 7) // 8 * 8        # keep >= 2 tiles when possible
    TB = min(int(tile_b), int(cap), max(8, half_b))
    return max(8, (TB // 8) * 8)


def classification_loss(reps, weight, bias, labels, *, num_classes,
                        use_custom_loss=False, opposite_class_loss_weight=2.0,
                        tile_b=1024, stream_dtype=jnp.bfloat16):
    """reps: [B, D], weight: [C, D] (PyTorch Linear layout), bias: [C],
    labels: [B] int.  Returns the scalar f32 mean loss.

    `stream_dtype` is the on-HBM streaming precision for reps / W (bf16 by
    default: halves HBM bytes on the mem-bound reps stream); all accumulation
    and epilogue math is f32.  Sweep tile_b in {512, 1024, 2048} per chip.
    """
    B, D = reps.shape
    C = num_classes
    stream_dtype = jnp.dtype(stream_dtype)
    itemsize = stream_dtype.itemsize

    reps_s = reps.astype(stream_dtype)

    # Lane-dense class padding: padded classes get zero weights and a very
    # negative bias, so they never influence softmax / cross entropy.
    C_pad = ((C + 127) // 128) * 128
    # Pre-transpose W once in XLA -> (D, C_pad): NN contraction in the kernel.
    w_pad = jnp.zeros((D, C_pad), dtype=stream_dtype).at[:, :C].set(
        weight.astype(stream_dtype).T)
    b_pad = jnp.full((1, C_pad), -1e9, dtype=jnp.float32).at[0, :C].set(
        bias.astype(jnp.float32))

    TB = _pick_batch_tile(B, D, C_pad, itemsize, tile_b)
    B_pad = ((B + TB - 1) // TB) * TB
    NT = B_pad // TB

    labels_i = labels.astype(jnp.int32)
    if B_pad != B:
        reps_s = jnp.zeros((B_pad, D), stream_dtype).at[:B].set(reps_s)
        labels_i = jnp.zeros((B_pad,), jnp.int32).at[:B].set(labels_i)
    labels2d = labels_i.reshape(B_pad, 1)

    kernel = _make_loss_kernel(use_custom_loss, C, opposite_class_loss_weight, B)

    cost = pl.CostEstimate(
        flops=2 * B_pad * D * C_pad,
        # one exp per element (+ one log per element on the custom path),
        # plus a per-row log / reciprocal
        transcendentals=B_pad * C_pad * (2 if use_custom_loss else 1) + 2 * B_pad,
        bytes_accessed=(B_pad * D + C_pad * D) * itemsize
        + 4 * (B_pad + C_pad + NT * 128))

    # Explicit scoped-VMEM limit sized from the actual tile footprint.
    vmem_need = (2 * C_pad * D * itemsize + 2 * C_pad * 4      # W + bias (dbl-buf)
                 + 2 * TB * D * itemsize + 2 * TB * 128 * 4    # reps + labels (dbl-buf)
                 + 8 * TB * C_pad * 4                          # f32 epilogue temps
                 + 2 * 128 * 4 + (1 << 20))                    # out tile + slack
    vmem_limit = int(min(64 << 20, max(32 << 20, vmem_need)))

    partial = pl.pallas_call(
        kernel,
        out_shape=jax.ShapeDtypeStruct((NT, 1, 128), jnp.float32),
        grid=(NT,),
        in_specs=[
            pl.BlockSpec((TB, 1), lambda i: (i, 0)),       # labels (streamed)
            pl.BlockSpec((TB, D), lambda i: (i, 0)),       # reps   (streamed)
            pl.BlockSpec((D, C_pad), lambda i: (0, 0)),    # W^T    (resident)
            pl.BlockSpec((1, C_pad), lambda i: (0, 0)),    # bias   (resident)
        ],
        out_specs=pl.BlockSpec((1, 1, 128), lambda i: (i, 0, 0)),
        compiler_params=pltpu.CompilerParams(
            dimension_semantics=("parallel",),
            vmem_limit_bytes=vmem_limit),
        cost_estimate=cost,
    )(labels2d, reps_s, w_pad, b_pad)

    # Per-tile partial sums (lane 0 of each tile) -> mean over the true batch.
    return jnp.sum(partial[:, 0, 0]) / B


def _reference_loss(reps, weight, bias, labels, *, num_classes,
                    use_custom_loss, opposite_class_loss_weight):
    """Pure-JAX reference mirroring the PyTorch semantics."""
    logits = reps.astype(jnp.float32) @ weight.astype(jnp.float32).T + bias
    if not use_custom_loss:
        logp = jax.nn.log_softmax(logits, axis=1)
        return -jnp.mean(logp[jnp.arange(reps.shape[0]), labels])
    mid_class = int((num_classes + 1) / 2)
    s_out = jax.nn.softmax(logits, axis=1)
    c_ids = jnp.arange(num_classes)[None, :]
    lab = labels[:, None]
    one_hot = (c_ids == lab)
    is_opp = jnp.where(lab < mid_class, c_ids >= mid_class, c_ids < mid_class)
    w = jnp.where(one_hot, 0.0,
                  jnp.where(is_opp, opposite_class_loss_weight, 1.0))
    return -jnp.mean(jnp.sum(jnp.log(1.0 - s_out + 1e-20) * w, axis=1))


if __name__ == "__main__":
    B, D, C = 20, 32, 4  # batch, sentence_embedding_dimension, num_classes

    key = jax.random.PRNGKey(0)
    k_reps, k_w, k_b, k_lab = jax.random.split(key, 4)

    reps = jax.random.normal(k_reps, (B, D), dtype=jnp.float32)
    # nn.Linear(D, C) init: uniform(-1/sqrt(D), 1/sqrt(D))
    bound = 1.0 / (D ** 0.5)
    weight = jax.random.uniform(k_w, (C, D), minval=-bound, maxval=bound,
                                dtype=jnp.float32)
    bias = jax.random.uniform(k_b, (C,), minval=-bound, maxval=bound,
                              dtype=jnp.float32)
    labels = jax.random.randint(k_lab, (B,), 0, C, dtype=jnp.int32)

    ok = True
    # tile_b=8 -> 3-tile grid with a ragged (masked) last tile at these shapes.
    # f32 streaming is compared at tight tolerance; bf16 streaming (the perf
    # default) is compared against a reference on bf16-rounded inputs.
    for use_custom in (False, True):
        for stream_dtype, tol in ((jnp.float32, 1e-5), (jnp.bfloat16, 1e-3)):
            loss = classification_loss(
                reps, weight, bias, labels, num_classes=C,
                use_custom_loss=use_custom, opposite_class_loss_weight=2.0,
                tile_b=8, stream_dtype=stream_dtype)
            loss = jax.block_until_ready(loss)
            r_ref = reps.astype(stream_dtype).astype(jnp.float32)
            w_ref = weight.astype(stream_dtype).astype(jnp.float32)
            ref = _reference_loss(
                r_ref, w_ref, bias, labels, num_classes=C,
                use_custom_loss=use_custom, opposite_class_loss_weight=2.0)
            if not jnp.allclose(loss, ref, rtol=tol, atol=tol):
                ok = False

    # TODO(synk): the labels=None branch of forward() returns (reps, logits);
    # only the loss-producing path is kernelized here (backbone + state
    # save/load helpers are outside the loss hot path).

    if ok:
        print("KERNEL_OK")
</pallas_src>

<mosaic_0001>
module attributes {stable_mosaic.version = 11 : i64} {
  func.func @kernel(%arg0: i32, %arg1: memref<8x1xi32, #tpu.memory_space<vmem>>, %arg2: memref<8x32xf32, #tpu.memory_space<vmem>>, %arg3: memref<32x128xf32, #tpu.memory_space<vmem>>, %arg4: memref<1x128xf32, #tpu.memory_space<vmem>>, %arg5: memref<1x1x128xf32, #tpu.memory_space<vmem>>) attributes {dimension_semantics = [#tpu.dimension_semantics<parallel>], iteration_bounds = array<i64: 3>, scalar_prefetch = 0 : i64, scratch_operands = 0 : i64, tpu.core_type = #tpu.core_type<tc>, window_params = [{transform_indices = @transform_0, window_bounds = array<i64: 8, 1>}, {transform_indices = @transform_1, window_bounds = array<i64: 8, 32>}, {pipeline_mode = #tpu.pipeline_mode<synchronous>, transform_indices = @transform_2, window_bounds = array<i64: 32, 128>}, {pipeline_mode = #tpu.pipeline_mode<synchronous>, transform_indices = @transform_3, window_bounds = array<i64: 1, 128>}, {transform_indices = @transform_4, window_bounds = array<i64: 1, 1, 128>}]} {
    %c0 = arith.constant 0 : index
    %c0_0 = arith.constant 0 : index
    %0 = vector.load %arg2[%c0, %c0_0] : memref<8x32xf32, #tpu.memory_space<vmem>>, vector<8x32xf32>
    %c0_1 = arith.constant 0 : index
    %c0_2 = arith.constant 0 : index
    %1 = vector.load %arg3[%c0_1, %c0_2] : memref<32x128xf32, #tpu.memory_space<vmem>>, vector<32x128xf32>
    %cst = arith.constant dense<0.000000e+00> : vector<8x128xf32>
    %2 = tpu.matmul %0, %1, %cst {dimension_numbers = #tpu.dot_dimension_numbers<[1], [0], [0], [1], [0, 0, 1, 1], [], []>} : vector<8x32xf32>, vector<32x128xf32>, vector<8x128xf32> -> vector<8x128xf32>
    %c0_3 = arith.constant 0 : index
    %c0_4 = arith.constant 0 : index
    %3 = vector.load %arg4[%c0_3, %c0_4] : memref<1x128xf32, #tpu.memory_space<vmem>>, vector<1x128xf32>
    %4 = vector.broadcast %3 : vector<1x128xf32> to vector<8x128xf32>
    %5 = arith.addf %2, %4 : vector<8x128xf32>
    %c0_5 = arith.constant 0 : index
    %c0_6 = arith.constant 0 : index
    %6 = vector.load %arg1[%c0_5, %c0_6] : memref<8x1xi32, #tpu.memory_space<vmem>>, vector<8x1xi32>
    %7 = tpu.iota {dimensions = array<i32: 1>} : vector<8x128xi32>
    %8 = vector.broadcast %6 : vector<8x1xi32> to vector<8x128xi32>
    %9 = arith.cmpi eq, %7, %8 : vector<8x128xi32>
    %c8_i32 = arith.constant 8 : i32
    %10 = arith.muli %arg0, %c8_i32 : i32
    %11 = tpu.iota {dimensions = array<i32: 0>} : vector<8x1xi32>
    %12 = vector.broadcast %10 : i32 to vector<8x1xi32>
    %13 = arith.addi %12, %11 : vector<8x1xi32>
    %c20_i32 = arith.constant 20 : i32
    %14 = vector.broadcast %c20_i32 : i32 to vector<8x1xi32>
    %15 = arith.cmpi slt, %13, %14 : vector<8x1xi32>
    %16 = arith.extui %15 : vector<8x1xi1> to vector<8x1xi32>
    %17 = arith.sitofp %16 : vector<8x1xi32> to vector<8x1xf32>
    %cst_7 = arith.constant dense<0xFF800000> : vector<8xf32>
    %18 = vector.multi_reduction <maximumf>, %5, %cst_7 [1] : vector<8x128xf32> to vector<8xf32>
    %19 = vector.shape_cast %18 : vector<8xf32> to vector<8x1xf32>
    %20 = vector.broadcast %19 : vector<8x1xf32> to vector<8x128xf32>
    %21 = arith.subf %5, %20 : vector<8x128xf32>
    %22 = math.exp %21 : vector<8x128xf32>
    %cst_8 = arith.constant dense<0.000000e+00> : vector<8xf32>
    %23 = vector.multi_reduction <add>, %22, %cst_8 [1] : vector<8x128xf32> to vector<8xf32>
    %24 = vector.shape_cast %23 : vector<8xf32> to vector<8x1xf32>
    %25 = math.log %24 : vector<8x1xf32>
    %26 = arith.addf %19, %25 : vector<8x1xf32>
    %cst_9 = arith.constant 0.000000e+00 : f32
    %27 = vector.broadcast %cst_9 : f32 to vector<8x128xf32>
    %28 = arith.select %9, %5, %27 : vector<8x128xi1>, vector<8x128xf32>
    %cst_10 = arith.constant dense<0.000000e+00> : vector<8xf32>
    %29 = vector.multi_reduction <add>, %28, %cst_10 [1] : vector<8x128xf32> to vector<8xf32>
    %30 = vector.shape_cast %29 : vector<8xf32> to vector<8x1xf32>
    %31 = arith.subf %26, %30 : vector<8x1xf32>
    %32 = arith.mulf %31, %17 : vector<8x1xf32>
    %33 = vector.shape_cast %32 : vector<8x1xf32> to vector<1x8x1xf32>
    %cst_11 = arith.constant dense<0.000000e+00> : vector<1xf32>
    %34 = vector.multi_reduction <add>, %33, %cst_11 [1, 2] : vector<1x8x1xf32> to vector<1xf32>
    %35 = vector.shape_cast %34 : vector<1xf32> to vector<1x1x1xf32>
    %36 = vector.extract %35[0, 0, 0] : f32 from vector<1x1x1xf32>
    %37 = vector.broadcast %36 : f32 to vector<1x1x128xf32>
    %c0_12 = arith.constant 0 : index
    %c0_13 = arith.constant 0 : index
    %c0_14 = arith.constant 0 : index
    %38 = vector.load %arg5[%c0_12, %c0_13, %c0_14] : memref<1x1x128xf32, #tpu.memory_space<vmem>>, vector<1x1x128xf32>
    tpu.vector_store %arg5[%c0_12, %c0_13, %c0_14], %37 {strides = array<i32>} : memref<1x1x128xf32, #tpu.memory_space<vmem>>, vector<1x1x128xf32>,
    return
  }
  func.func @transform_0(%arg0: i32) -> (i32, i32) {
    %c0_i32 = arith.constant 0 : i32
    %c0_i32_0 = arith.constant 0 : i32
    return %arg0, %c0_i32 : i32, i32
  }
  func.func @transform_1(%arg0: i32) -> (i32, i32) {
    %c0_i32 = arith.constant 0 : i32
    %c0_i32_0 = arith.constant 0 : i32
    return %arg0, %c0_i32 : i32, i32
  }
  func.func @transform_2(%arg0: i32) -> (i32, i32) {
    %c0_i32 = arith.constant 0 : i32
    %c0_i32_0 = arith.constant 0 : i32
    %c0_i32_1 = arith.constant 0 : i32
    return %c0_i32, %c0_i32_0 : i32, i32
  }
  func.func @transform_3(%arg0: i32) -> (i32, i32) {
    %c0_i32 = arith.constant 0 : i32
    %c0_i32_0 = arith.constant 0 : i32
    %c0_i32_1 = arith.constant 0 : i32
    return %c0_i32, %c0_i32_0 : i32, i32
  }
  func.func @transform_4(%arg0: i32) -> (i32, i32, i32) {
    %c0_i32 = arith.constant 0 : i32
    %c0_i32_0 = arith.constant 0 : i32
    %c0_i32_1 = arith.constant 0 : i32
    return %arg0, %c0_i32, %c0_i32_0 : i32, i32, i32
  }
}

</mosaic_0001>

<bundles_post_ra>
// kernel: tpu_custom_call.1
= control target key start
LH: loop header
LB: loop body
LE: loop exit
PB: predicated region body
PF: predicated region fallthrough
CT: control target
= control target key end

     0   :  { %9 = vsyncpa [#allocation3], 0  ;;  %s699_s0 = inlined_call_operand.vmem [shape: s32[24,1], index: 0, kind: input, shape index: {}]   ;;  %s700_s1 = inlined_call_operand.vmem [shape: f32[24,32], index: 1, kind: input, shape index: {}]   ;;  %s701_s2 = inlined_call_operand.hbm [shape: f32[32,128], index: 2, kind: input, shape index: {}]   ;;  %s702_s3 = inlined_call_operand.vmem [shape: f32[1,128], index: 3, kind: input, shape index: {}]   ;;  %s703_s4 = inlined_call_operand.hbm [shape: f32[3,1,128], index: 4, kind: output, shape index: {}]  }
   0x1   :  { %10 = vsyncpa [#allocation4], 0 }
   0x2   :  { %12 = vsyncpa [#allocation4 + $0x1], 0  ;;  %s597_s15 = smov 0   ;;  %s599_s16 = smov 0  }
   0x3   :  { %s601_s17 = smov 0   ;;  %s603_s18 = smov 0  }
   0x4 LB: > { %s618_s19 = sadd.s32 4294967295, %s565_s18   ;;  %s394_s20 = sadd.s32 4294967294, %s565_s18   ;;  %s565_s18 = sphi %s603_s18, %s709_s18   ;;  %s561_s17 = sphi %s601_s17, %s708_s17   ;;  %s557_s16 = sphi %s599_s16, %s707_s16   ;;  %s553_s15 = sphi %s597_s15, %s706_s15  }
   0x5   : > { %s622_s21 = sadd.s32 1, %s565_s18   ;;  %s119_s22 = sadd.s32 1, %s561_s17 }
   0x6   : > { %s116_s23 = ssub.s32 %s565_s18, %s622_s21  ;;  %p129_p0 = scmp.ne.s32.totalorder %s561_s17, %s557_s16 }
   0x7   : > { %p117_p1 = scmp.eq.s32.totalorder %s116_s23, 0  ;;  %p130_p2 = scmp.eq.s32.totalorder %s618_s19, 2 }
   0x8   : > { %p135_p3 = scmp.ne.s32.totalorder %s557_s16, %s553_s15  ;;  %p136_p4 = scmp.eq.s32.totalorder %s394_s20, 2 }
   0x9   : > { %s633_s24 = scalar_select %p117_p1, %s561_s17, %s119_s22  }
   0xa   : > { %p635_p5 = por %p130_p2, %p129_p0  ;;  %p639_p6 = por %p136_p4, %p135_p3 }
   0xb   : > { %p395_p7 = scmp.ge.s32.totalorder %s565_s18, 1  ;;  %p143_p8 = scmp.lt.s32.totalorder %s565_s18, 4 }
   0xc   : > { %p423_p9 = scmp.eq.s32.totalorder %s618_s19, 0  ;;  %s154_s29 = sshll.u32 %s701_s2, 4  ;;  %s155_s29 = int_to_ptr.hbm [resolvable:$true] %s154_s29 }
   0xd   : > { %p144_p10 = pnand %p395_p7, %p143_p8  ;;  %s567_s30 = smov [#allocation2]  }
   0xe   : > { %s156_s5 = sshll.u32 %s567_s30, 4  ;;  %s568_s6 = smov 128   ;;  %s157_s5 = int_to_ptr.vmem [resolvable:$true] %s156_s5 }
   0xf   : > { %p415_p11 = pneg %p144_p10  ;;  %s569_s7 = smov 8  }
  0x10   : > { %189 = sbr.rel (%p144_p10) target bundleno = 599 (0x257), region = 36 }
  0x11   : > { %p416_p12 = pnand %p423_p9, %p415_p11 }
  0x13   : > { %418 = dma.hbm_to_vmem [thread:$0]  (!%p416_p12), %s155_s29, 512, %s157_s5, [#allocation3], %s568_s6, %s568_s6, %s569_s7  }
  0x15   : > { %544 = dma.done.wait (%p423_p9), [#allocation3], 512  }
  0x16   : > { %546 = vsyncadd (%p423_p9), [#allocation3], 4294966784  ;;  %p218_p13 = scmp.lt.s32.totalorder %s618_s19, 2  ;;  %v230_v0 = vld [vmem:[#allocation2 + $0x18] sm:$0xff]  ;;  %v229_v1 = vld [vmem:[#allocation2 + $0x10] sm:$0xff]  ;;  %vm235_vm0 = vcmask 261120   ;;  %v260_v14 = vlaneseq  ;;  %s311_s5 = scalar_lea.hbm %s703_s4, %s618_s19 }
  0x17   : > { %251 = vmatpush.msra.mxu0 %v230_v0  ;;  %v228_v2 = vld [vmem:[#allocation2 + $0x8] sm:$0xff]  ;;  %v227_v3 = vld [vmem:[#allocation2] sm:$0xff]  ;;  %v570_v5 = vmov 0   ;;  %s403_s27 = sshll.u32 %s618_s19, 3  ;;  %v571_v26 = vmov 0.0   ;;  %vm289_vm3 = vcmask 7168  }
  0x18   : > { %s219_s8 = scalar_select %p218_p13, %s618_s19, 2  ;;  %463 = vset.pattern.permute.xlu0 %v570_v5  ;;  %v464_v6 = vld [vmem:[%s702_s3] ss:$0 sm:$0xff]  ;;  %v261_v15 = vand.u32 127, %v260_v14  ;;  %v268_v19 = vshrl.u32 %v260_v14, 7  ;;  %v269_v20 = vstv %s403_s27 }
  0x19   : > { %252 = vmatpush.msra.mxu0 %v229_v1  ;;  %s216_s28 = sand.u32 1, %s557_s16   ;;  %s519_s19 = scalar_lea.hbm %s703_s4, 3 }
  0x1a   : > { %s400_s9 = sshll.u32 %s219_s8, 3  ;;  %v270_v21 = vadd.s32 %v269_v20, %v268_v19  ;;  %s217_s6 = scalar_lea.vmem [#allocation5], %s216_s28 }
  0x1b   : > { %s225_s12 = scalar_lea.vmem %s700_s1, %s400_s9  ;;  %253 = vmatpush.msra.mxu0 %v228_v2  ;;  %s221_s23 = scalar_lea.vmem %s699_s0, %s400_s9 }
  0x1c   : > { %v226_v4 = vld [vmem:[%s225_s12] sm:$0xff]  ;;  %vm271_vm2 = vcmp.lt.s32.totalorder %v270_v21, 20  ;;  %s313_s7 = sshll.u32 %s217_s6, 4  ;;  %s315_s8 = sshll.u32 %s311_s5, 4  ;;  %s314_s7 = int_to_ptr.vmem [resolvable:$true] %s313_s7  ;;  %s316_s8 = int_to_ptr.hbm [resolvable:$true] %s315_s8 }
  0x1d   : > { %254 = vmatpush.msra.mxu0 %v227_v3  ;;  %v259_v9 = vld [vmem:[%s221_s23] sm:$0xff]  ;;  %v404_v27 = vsel %vm271_vm2, 1.0, %v571_v26  ;;  %s303_s10 = scalar_lea.sflag [#allocation4], %s216_s28  ;;  %s513_s11 = sshra.s32 %s316_s8, 4  ;;  %s514_s11 = int_to_ptr.hbm [resolvable:$true] %s513_s11 }
  0x1e   : > { %402 = vmatmul.msk.f32.vlgmr.msra.gmra.mxu0 %vm235_vm0, %v226_v4  ;;  %s515_s12 = scalar_lea.hbm %s514_s11, 1  ;;  %p520_p3 = scmp.lt.s32.totalorder %s514_s11, %s703_s4 }
  0x1f   : > { %p516_p0 = scmp.ne.s32.totalorder %s514_s11, %s515_s12  ;;  %p521_p4 = scmp.lt.s32.totalorder %s519_s19, %s515_s12 }
  0x21   : > { %p517_p1 = pnand %p516_p0, %p635_p5  ;;  %p522_p7 = por %p521_p4, %p520_p3 }
  0x23   : > { %p518_p2 = pneg %p517_p1 }
  0x25   : > { %p523_p8 = pnand %p522_p7, %p518_p2 }
  0x9b   : > { %v256_v7 = vpop.f32.mrf.mxu0 }
  0x9c   : > { %v257_v8 = vadd.f32 %v464_v6, %v256_v7 }
  0x9e   : > { %274 = vmax.xlane.f32.xlu0 %v257_v8 }
  0xb2   : > { %263 = vperm.xlu0 %463, %v259_v9  }
 0x111   : > { %v275_v10 = vpop.xlane.xlu0 %274 }
 0x112   : > { %v276_v11 = vsub.f32 %v257_v8, %v275_v10 }
 0x114   : > { %v277_v12 = vmul.f32 1.442695, %v276_v11 }
 0x116   : > { %465 = vpow2.f32 %v277_v12 }
 0x11c   : > { %v466_v13 = vpop.eup %465 }
 0x11d   : > { %279 = vadd.xlane.f32.xlu1 %v466_v13 }
 0x124   : > { %v264_v16 = vpop.permute.xlu0 %263 }
 0x125   : > { %vm265_vm1 = vcmp.eq.s32.totalorder %v261_v15, %v264_v16 }
 0x126   : > { %v284_v17 = vsel %vm265_vm1, %v257_v8, 0.0 }
 0x127   : > { %285 = vadd.xlane.f32.xlu1 %v284_v17 }
 0x190   : > { %v280_v18 = vpop.xlane.xlu1 %279 }
 0x191   : > { %467 = vlog2.f32 %v280_v18 }
 0x197   : > { %v468_v22 = vpop.eup %467 }
 0x198   : > { %v282_v23 = vmul.f32 0.6931472, %v468_v22 }
 0x19a   : > { %v283_v24 = vadd.f32 %v282_v23, %v275_v10  ;;  %v286_v25 = vpop.xlane.xlu1 %285 }
 0x19c   : > { %v287_v28 = vsub.f32 %v283_v24, %v286_v25 }
 0x19e   : > { %v288_v29 = vmul.f32 %v404_v27, %v287_v28 }
 0x1a0   : > { %v290_v30 = vsel %vm289_vm3, %v288_v29, 0.0 }
 0x1a1   : > { %291 = vadd.xlane.f32.xlu2 %v290_v30 }
 0x214   : > { %v292_v31 = vpop.xlane.xlu2 %291 }
 0x215   : > { %v293_v32 = vrot.slane %v292_v31, 4 }
 0x217   : > { %v294_v33 = vadd.f32 %v293_v32, %v292_v31 }
 0x219   : > { %v295_v34 = vrot.slane %v294_v33, 2 }
 0x21b   : > { %v296_v35 = vadd.f32 %v295_v34, %v294_v33 }
 0x21d   : > { %v297_v36 = vrot.slane %v296_v35, 1 }
 0x21f   : > { %v298_v37 = vadd.f32 %v297_v36, %v296_v35 }
 0x221   : > { %407 = vpush %v298_v37 }
 0x252   : > { %s408_s9 = spop %407 }
 0x253   : > { %v300_v38 = vstv %s408_s9 }
 0x254   : > { %301 = vst [vmem:[%s217_s6] sm:$0x1] %v300_v38 }
 0x255   : > { %526 = shalt.err (!%p523_p8)
}
 0x256   : > { %413 = dma.vmem_to_hbm [thread:$0]  (%p635_p5), %s314_s7, 16, %s316_s8, %s303_s10  }
 0x257 PF: > { %p425_p9 = scmp.ge.s32.totalorder %s565_s18, 2  ;;  %s327_s23 = sand.u32 1, %s553_s15  }
 0x258   : > { %s328_s27 = scalar_lea.sflag [#allocation4], %s327_s23 }
 0x259   : > { %p420_p10 = pnand %p425_p9, %p639_p6 }
 0x25b   : > { %p421_p11 = pneg %p420_p10 }
 0x25d   : > { %548 = dma.done.wait (%p421_p11), %s328_s27, 16  }
 0x25e   : > { %550 = vsyncadd (%p421_p11), %s328_s27, 4294967280  ;;  %p15_p12 = scmp.ge.s32.totalorder %s622_s21, 5   ;;  %s706_s15 = smov %s557_s16 }
 0x25f   : > { %s707_s16 = smov %s561_s17  ;;  %s708_s17 = smov %s633_s24 }
 0x260   : > { %s709_s18 = smov %s622_s21  ;;  %17 = sbr.rel (!%p15_p12) target bundleno = 4 (0x4), region = 79 }
 0x265   :  { %333 = vsyncpa [#allocation3], 1 }
 0x266   :  { %335 = vsyncpa [#allocation3 + $0x1], 1 }
 0x267   :  { %336 = vsyncpa [#allocation4], 1 }
 0x268   :  { %338 = vsyncpa [#allocation4 + $0x1], 1 }

</bundles_post_ra>
